<compile_context>
chip_gen: v7x
topology: tpu7x:2x2x1
jax: 0.10.0
libtpu: 0.0.40
codegen_flags: <defaults>
</compile_context>

<pallas_src>
import functools
import math

import jax
import jax.numpy as jnp
from jax.experimental import pallas as pl
from jax.experimental.pallas import tpu as pltpu

# f32-accurate matmuls everywhere (kernel trace in interpret mode + reference).
jax.config.update("jax_default_matmul_precision", "highest")


# --------------------------------------------------------------------------
# kernels
# --------------------------------------------------------------------------
def _sdpa_kernel(q_ref, k_ref, v_ref, o_ref, a_ref, *, scale):
    q = q_ref[...] * scale                       # (G, TQ, d_k) — scale folded into Q
    k = k_ref[...]                               # (G, S,  d_k)
    v = v_ref[...]                               # (G, S,  d_k)

    # scores = q @ k^T over the last axes (no explicit transpose of K).
    s = jnp.einsum("gqd,gkd->gqk", q, k,
                   preferred_element_type=jnp.float32)        # (G, TQ, S)

    m = jnp.max(s, axis=-1, keepdims=True)
    e = jnp.exp(s - m)
    denom = jnp.sum(e, axis=-1, keepdims=True)
    p = e * (1.0 / denom)                        # exact: one divide per row, then mul

    o = jnp.einsum("gqk,gkd->gqd", p.astype(v.dtype), v,
                   preferred_element_type=jnp.float32)        # (G, TQ, d_k)
    o_ref[...] = o.astype(o_ref.dtype)
    a_ref[...] = p.astype(a_ref.dtype)


def _sdpa_masked_kernel(q_ref, k_ref, v_ref, m_ref, o_ref, a_ref, *, scale):
    q = q_ref[...] * scale                       # (G, TQ, d_k)
    k = k_ref[...]                               # (G, S,  d_k)
    v = v_ref[...]                               # (G, S,  d_k)
    mask = m_ref[...]                            # (1 or G, TQ, S) int8; 0 = masked

    s = jnp.einsum("gqd,gkd->gqk", q, k,
                   preferred_element_type=jnp.float32)        # (G, TQ, S)
    s = jnp.where(mask == 0, jnp.float32(-1e9), s)

    m = jnp.max(s, axis=-1, keepdims=True)
    e = jnp.exp(s - m)
    denom = jnp.sum(e, axis=-1, keepdims=True)
    p = e * (1.0 / denom)

    o = jnp.einsum("gqk,gkd->gqd", p.astype(v.dtype), v,
                   preferred_element_type=jnp.float32)
    o_ref[...] = o.astype(o_ref.dtype)
    a_ref[...] = p.astype(a_ref.dtype)


# --------------------------------------------------------------------------
# tile-size / VMEM heuristics (layout- and generation-aware)
# --------------------------------------------------------------------------
def _round_up(x, m):
    return ((x + m - 1) // m) * m


def _sublane_multiple(itemsize):
    # f32 -> 8, bf16 -> 16, int8 -> 32 sublanes per physical tile.
    return max(8, 32 // max(itemsize, 1))


def _padded_tile_bytes(shape, itemsize):
    """Physical VMEM footprint of a tile: last dim rounded to 128 lanes,
    second-to-last dim rounded to the dtype sublane multiple."""
    dims = list(shape)
    dims[-1] = _round_up(dims[-1], 128)
    if len(dims) >= 2:
        dims[-2] = _round_up(dims[-2], _sublane_multiple(itemsize))
    n = 1
    for d in dims:
        n *= d
    return n * itemsize


def _estimate_vmem_bytes(G, TQ, S, d_k, itemsize, has_mask, attn_itemsize):
    q = _padded_tile_bytes((G, TQ, d_k), itemsize)             # Q tile
    o = _padded_tile_bytes((G, TQ, d_k), itemsize)             # output tile
    kv = 2 * _padded_tile_bytes((G, S, d_k), itemsize)         # K + V (resident)
    attn = _padded_tile_bytes((G, TQ, S), attn_itemsize)       # attn writeback tile
    msk = _padded_tile_bytes((G, TQ, S), 1) if has_mask else 0  # int8 mask tile
    scratch = 3 * _padded_tile_bytes((G, TQ, S), 4)            # f32 scores/exp/probs
    return 2 * (q + o + kv + attn + msk) + scratch              # x2 double buffering


def _vmem_capacity_bytes():
    """Per-core VMEM capacity; conservative (v7x-sized) fallback if unknown."""
    try:
        info = pltpu.get_tpu_info()
        cap = int(getattr(info, "vmem_capacity_bytes", 0) or 0)
        if cap > 0:
            return cap
    except Exception:
        pass
    return 64 << 20


def _tq_candidates(S, tq_max):
    """Query-tile sizes: full S for short sequences, else divisors of S
    (preferring sublane-aligned multiples of 8), largest first."""
    if S <= tq_max:
        return [S]
    divs = [t for t in range(tq_max, 0, -1) if S % t == 0]
    aligned = [t for t in divs if t % 8 == 0]
    return aligned or divs or [S]


def _choose_tiles(H, S, d_k, itemsize, has_mask, attn_itemsize, budget, tq_max):
    """Pick (G heads per step, TQ query tile) under the VMEM budget.
    Prefers filling ~128 lanes with heads, then the largest query tile."""
    g_max = max(1, min(H, 128 // max(d_k, 1)))
    while H % g_max:
        g_max -= 1
    tqs = _tq_candidates(S, tq_max)
    best = None          # smallest footprint seen, as graceful fallback
    for g in range(g_max, 0, -1):
        if H % g:
            continue
        for tq in tqs:                            # largest tile that fits wins
            est = _estimate_vmem_bytes(g, tq, S, d_k, itemsize, has_mask,
                                       attn_itemsize)
            if est <= budget:
                return g, tq, est
            if best is None or est < best[0]:
                best = (est, g, tq)
    est, g, tq = best
    return g, tq, est    # nothing fits: degrade to the smallest footprint


def _prepare_mask(mask, B, H, S):
    """Cast mask to int8 at its *native* batch/head extent (no BH broadcast)."""
    m = jnp.asarray(mask)
    while m.ndim < 4:
        m = m[None]
    Bm, Hm, S1, S2 = m.shape
    if (S1, S2) != (S, S):
        m = jnp.broadcast_to(m, (Bm, Hm, S, S))
    if Hm not in (1, H):
        m = jnp.broadcast_to(m, (Bm, H, S, S))
        Hm = H
    if Bm not in (1, B):
        m = jnp.broadcast_to(m, (B, Hm, S, S))
        Bm = B
    m = (m != 0).astype(jnp.int8).reshape(Bm * Hm, S, S)
    return m, Bm, Hm


# --------------------------------------------------------------------------
# wrapper
# --------------------------------------------------------------------------
def scaled_dot_product_attention(Q, K, V, mask=None, *, attn_dtype=None):
    """Pallas TPU implementation of ScaledDotProductAttention.forward.

    Q, K, V: [B, H, S, d_k]; mask: optional, broadcastable to [B, H, S, S]
    (0 = masked out).  Returns (output [B, H, S, d_k], attn [B, H, S, S]).
    attn_dtype (optional, e.g. jnp.bfloat16) shrinks the attn HBM stream;
    default keeps the input dtype to match the PyTorch module.
    """
    B, H, S, d_k = Q.shape
    BH = B * H
    itemsize = jnp.dtype(Q.dtype).itemsize
    attn_dtype = Q.dtype if attn_dtype is None else jnp.dtype(attn_dtype)
    attn_itemsize = jnp.dtype(attn_dtype).itemsize

    # Generation-aware VMEM budgets (v5e/v6e: 128 MiB, v7x: 64 MiB).
    cap = _vmem_capacity_bytes()
    budget = int(cap * 0.70)        # tiling budget (leave Mosaic headroom)
    limit_cap = int(cap * 0.80)     # hard cap for vmem_limit_bytes
    tq_max = 1024 if cap >= (96 << 20) else 512

    G, TQ, est = _choose_tiles(H, S, d_k, itemsize, mask is not None,
                               attn_itemsize, budget, tq_max)
    grid = (BH // G, S // TQ)
    scale = 1.0 / math.sqrt(d_k)

    q = Q.reshape(BH, S, d_k)
    k = K.reshape(BH, S, d_k)
    v = V.reshape(BH, S, d_k)

    # NOTE: kv_spec's index_map must stay independent of j and the query-tile
    # axis must stay innermost, so K/V stay VMEM-resident across all query
    # tiles of a head group (no re-DMA of K/V).
    q_spec = pl.BlockSpec((G, TQ, d_k), lambda i, j: (i, j, 0))
    kv_spec = pl.BlockSpec((G, S, d_k), lambda i, j: (i, 0, 0))
    o_spec = pl.BlockSpec((G, TQ, d_k), lambda i, j: (i, j, 0))
    a_spec = pl.BlockSpec((G, TQ, S), lambda i, j: (i, j, 0))

    out_shape = (
        jax.ShapeDtypeStruct((BH, S, d_k), Q.dtype),
        jax.ShapeDtypeStruct((BH, S, S), attn_dtype),
    )

    vmem_limit = int(min(max(int(1.25 * est), 32 << 20), limit_cap))
    compiler_params = pltpu.CompilerParams(
        dimension_semantics=("parallel", "parallel"),
        vmem_limit_bytes=vmem_limit,
    )

    if mask is None:
        out, attn = pl.pallas_call(
            functools.partial(_sdpa_kernel, scale=scale),
            out_shape=out_shape,
            grid=grid,
            in_specs=[q_spec, kv_spec, kv_spec],
            out_specs=(o_spec, a_spec),
            compiler_params=compiler_params,
        )(q, k, v)
    else:
        mflat, Bm, Hm = _prepare_mask(mask, B, H, S)
        if Hm == 1:
            # one mask block per batch, re-used by all G heads of the group
            m_block = (1, TQ, S)
            if Bm > 1:
                m_map = lambda i, j: ((i * G) // H, j, 0)
            else:
                m_map = lambda i, j: (0, j, 0)
        else:
            # per-head mask: take the G masks of this head group
            m_block = (G, TQ, S)
            hpg = H // G
            if Bm > 1:
                m_map = lambda i, j: (i, j, 0)
            else:
                m_map = lambda i, j: (i % hpg, j, 0)
        m_spec = pl.BlockSpec(m_block, m_map)

        out, attn = pl.pallas_call(
            functools.partial(_sdpa_masked_kernel, scale=scale),
            out_shape=out_shape,
            grid=grid,
            in_specs=[q_spec, kv_spec, kv_spec, m_spec],
            out_specs=(o_spec, a_spec),
            compiler_params=compiler_params,
        )(q, k, v, mflat)

    return out.reshape(B, H, S, d_k), attn.reshape(B, H, S, S)


# --------------------------------------------------------------------------
# reference + test
# --------------------------------------------------------------------------
def _reference(Q, K, V, mask=None):
    d_k = Q.shape[-1]
    scores = jnp.matmul(Q, jnp.swapaxes(K, -2, -1),
                        precision=jax.lax.Precision.HIGHEST)
    scores = scores / jnp.sqrt(jnp.float32(d_k))
    if mask is not None:
        scores = jnp.where(mask == 0, jnp.float32(-1e9), scores)
    attn = jax.nn.softmax(scores, axis=-1)
    out = jnp.matmul(attn, V, precision=jax.lax.Precision.HIGHEST)
    return out, attn


if __name__ == "__main__":
    B, H, S, d_k = 2, 2, 8, 32

    key = jax.random.PRNGKey(0)
    kq, kk, kvv, km = jax.random.split(key, 4)
    Q = jax.random.normal(kq, (B, H, S, d_k), dtype=jnp.float32)
    K = jax.random.normal(kk, (B, H, S, d_k), dtype=jnp.float32)
    V = jax.random.normal(kvv, (B, H, S, d_k), dtype=jnp.float32)
    # Random mask shared across heads (0 = masked position).
    mask = (jax.random.uniform(km, (B, 1, S, S)) > 0.2).astype(jnp.int32)

    # Unmasked path
    out, attn = scaled_dot_product_attention(Q, K, V)
    jax.block_until_ready((out, attn))
    ref_out, ref_attn = _reference(Q, K, V)
    assert jnp.allclose(out, ref_out, atol=2e-3, rtol=2e-3), "unmasked output mismatch"
    assert jnp.allclose(attn, ref_attn, atol=2e-3, rtol=2e-3), "unmasked attn mismatch"

    # Masked path
    out_m, attn_m = scaled_dot_product_attention(Q, K, V, mask=mask)
    jax.block_until_ready((out_m, attn_m))
    ref_out_m, ref_attn_m = _reference(Q, K, V, mask=mask)
    assert jnp.allclose(out_m, ref_out_m, atol=2e-3, rtol=2e-3), "masked output mismatch"
    assert jnp.allclose(attn_m, ref_attn_m, atol=2e-3, rtol=2e-3), "masked attn mismatch"

    print("KERNEL_OK")
</pallas_src>

<mosaic_0001>
module attributes {stable_mosaic.version = 11 : i64} {
  func.func @_sdpa_kernel(%arg0: i32, %arg1: i32, %arg2: memref<2x8x32xf32, #tpu.memory_space<vmem>>, %arg3: memref<2x8x32xf32, #tpu.memory_space<vmem>>, %arg4: memref<2x8x32xf32, #tpu.memory_space<vmem>>, %arg5: memref<2x8x32xf32, #tpu.memory_space<vmem>>, %arg6: memref<2x8x8xf32, #tpu.memory_space<vmem>>) attributes {dimension_semantics = [#tpu.dimension_semantics<parallel>, #tpu.dimension_semantics<parallel>], iteration_bounds = array<i64: 2, 1>, scalar_prefetch = 0 : i64, scratch_operands = 0 : i64, tpu.core_type = #tpu.core_type<tc>, window_params = [{transform_indices = @transform_0, window_bounds = array<i64: 2, 8, 32>}, {transform_indices = @transform_1, window_bounds = array<i64: 2, 8, 32>}, {transform_indices = @transform_2, window_bounds = array<i64: 2, 8, 32>}, {transform_indices = @transform_3, window_bounds = array<i64: 2, 8, 32>}, {transform_indices = @transform_4, window_bounds = array<i64: 2, 8, 8>}]} {
    %c0 = arith.constant 0 : index
    %c0_0 = arith.constant 0 : index
    %c0_1 = arith.constant 0 : index
    %0 = vector.load %arg2[%c0, %c0_0, %c0_1] : memref<2x8x32xf32, #tpu.memory_space<vmem>>, vector<2x8x32xf32>
    %cst = arith.constant 0.176776692 : f32
    %1 = vector.broadcast %cst : f32 to vector<2x8x32xf32>
    %2 = arith.mulf %0, %1 : vector<2x8x32xf32>
    %c0_2 = arith.constant 0 : index
    %c0_3 = arith.constant 0 : index
    %c0_4 = arith.constant 0 : index
    %3 = vector.load %arg3[%c0_2, %c0_3, %c0_4] : memref<2x8x32xf32, #tpu.memory_space<vmem>>, vector<2x8x32xf32>
    %c0_5 = arith.constant 0 : index
    %c0_6 = arith.constant 0 : index
    %c0_7 = arith.constant 0 : index
    %4 = vector.load %arg4[%c0_5, %c0_6, %c0_7] : memref<2x8x32xf32, #tpu.memory_space<vmem>>, vector<2x8x32xf32>
    "tpu.trace_start"() <{level = 10 : i32, message = "gqd,gkd->gqk"}> : () -> ()
    %cst_8 = arith.constant dense<0.000000e+00> : vector<2x8x8xf32>
    %5 = tpu.matmul %2, %3, %cst_8 {dimension_numbers = #tpu.dot_dimension_numbers<[2], [2], [1], [1], [0, 0, 0, 1, 1, 1], [0], [0]>, precision = #tpu.contract_precision<fp32>} : vector<2x8x32xf32>, vector<2x8x32xf32>, vector<2x8x8xf32> -> vector<2x8x8xf32>
    "tpu.trace_stop"() : () -> ()
    %cst_9 = arith.constant dense<0xFF800000> : vector<2x8xf32>
    %6 = vector.multi_reduction <maximumf>, %5, %cst_9 [2] : vector<2x8x8xf32> to vector<2x8xf32>
    %7 = vector.shape_cast %6 : vector<2x8xf32> to vector<2x8x1xf32>
    %8 = vector.broadcast %7 : vector<2x8x1xf32> to vector<2x8x8xf32>
    %9 = arith.subf %5, %8 : vector<2x8x8xf32>
    %10 = math.exp %9 : vector<2x8x8xf32>
    %cst_10 = arith.constant dense<0.000000e+00> : vector<2x8xf32>
    %11 = vector.multi_reduction <add>, %10, %cst_10 [2] : vector<2x8x8xf32> to vector<2x8xf32>
    %12 = vector.shape_cast %11 : vector<2x8xf32> to vector<2x8x1xf32>
    %cst_11 = arith.constant 1.000000e+00 : f32
    %13 = vector.broadcast %cst_11 : f32 to vector<2x8x1xf32>
    %14 = arith.divf %13, %12 : vector<2x8x1xf32>
    %15 = vector.broadcast %14 : vector<2x8x1xf32> to vector<2x8x8xf32>
    %16 = arith.mulf %10, %15 : vector<2x8x8xf32>
    "tpu.trace_start"() <{level = 10 : i32, message = "gqk,gkd->gqd"}> : () -> ()
    %cst_12 = arith.constant dense<0.000000e+00> : vector<2x8x32xf32>
    %17 = tpu.matmul %16, %4, %cst_12 {dimension_numbers = #tpu.dot_dimension_numbers<[2], [1], [1], [2], [0, 0, 0, 1, 1, 2], [0], [0]>, precision = #tpu.contract_precision<fp32>} : vector<2x8x8xf32>, vector<2x8x32xf32>, vector<2x8x32xf32> -> vector<2x8x32xf32>
    "tpu.trace_stop"() : () -> ()
    %c0_13 = arith.constant 0 : index
    %c0_14 = arith.constant 0 : index
    %c0_15 = arith.constant 0 : index
    %18 = vector.load %arg5[%c0_13, %c0_14, %c0_15] : memref<2x8x32xf32, #tpu.memory_space<vmem>>, vector<2x8x32xf32>
    tpu.vector_store %arg5[%c0_13, %c0_14, %c0_15], %17 {strides = array<i32>} : memref<2x8x32xf32, #tpu.memory_space<vmem>>, vector<2x8x32xf32>,
    %c0_16 = arith.constant 0 : index
    %c0_17 = arith.constant 0 : index
    %c0_18 = arith.constant 0 : index
    %19 = vector.load %arg6[%c0_16, %c0_17, %c0_18] : memref<2x8x8xf32, #tpu.memory_space<vmem>>, vector<2x8x8xf32>
    tpu.vector_store %arg6[%c0_16, %c0_17, %c0_18], %16 {strides = array<i32>} : memref<2x8x8xf32, #tpu.memory_space<vmem>>, vector<2x8x8xf32>,
    return
  }
  func.func @transform_0(%arg0: i32, %arg1: i32) -> (i32, i32, i32) {
    %c0_i32 = arith.constant 0 : i32
    %c0_i32_0 = arith.constant 0 : i32
    return %arg0, %arg1, %c0_i32 : i32, i32, i32
  }
  func.func @transform_1(%arg0: i32, %arg1: i32) -> (i32, i32, i32) {
    %c0_i32 = arith.constant 0 : i32
    %c0_i32_0 = arith.constant 0 : i32
    %c0_i32_1 = arith.constant 0 : i32
    return %arg0, %c0_i32, %c0_i32_0 : i32, i32, i32
  }
  func.func @transform_2(%arg0: i32, %arg1: i32) -> (i32, i32, i32) {
    %c0_i32 = arith.constant 0 : i32
    %c0_i32_0 = arith.constant 0 : i32
    %c0_i32_1 = arith.constant 0 : i32
    return %arg0, %c0_i32, %c0_i32_0 : i32, i32, i32
  }
  func.func @transform_3(%arg0: i32, %arg1: i32) -> (i32, i32, i32) {
    %c0_i32 = arith.constant 0 : i32
    %c0_i32_0 = arith.constant 0 : i32
    return %arg0, %arg1, %c0_i32 : i32, i32, i32
  }
  func.func @transform_4(%arg0: i32, %arg1: i32) -> (i32, i32, i32) {
    %c0_i32 = arith.constant 0 : i32
    %c0_i32_0 = arith.constant 0 : i32
    return %arg0, %arg1, %c0_i32 : i32, i32, i32
  }
}

</mosaic_0001>

<bundles_post_ra>
// kernel: tpu_custom_call.1
= control target key start
LH: loop header
LB: loop body
LE: loop exit
PB: predicated region body
PF: predicated region fallthrough
CT: control target
= control target key end

     0   :  { %s3373_s0 = inlined_call_operand.hbm [shape: f32[4,8,32], index: 0, kind: input, shape index: {}]   ;;  %s3374_s1 = inlined_call_operand.hbm [shape: f32[4,8,32], index: 1, kind: input, shape index: {}]   ;;  %s3375_s2 = inlined_call_operand.hbm [shape: f32[4,8,32], index: 2, kind: input, shape index: {}]   ;;  %s3376_s3 = inlined_call_operand.hbm [shape: f32[4,8,32], index: 3, kind: output, shape index: {0}]   ;;  %s3377_s4 = inlined_call_operand.hbm [shape: f32[4,8,8], index: 4, kind: output, shape index: {1}]  }
   0x1   :  { %3389 = sst [smem:[#allocation19_spill]] %s3374_s1 }
   0x2   :  { %10 = vsyncpa [#allocation3], 0 }
   0x3   :  { %12 = vsyncpa [#allocation3 + $0x1], 0 }
   0x4   :  { %13 = vsyncpa [#allocation6], 0 }
   0x5   :  { %15 = vsyncpa [#allocation6 + $0x1], 0 }
   0x6   :  { %16 = vsyncpa [#allocation4], 0 }
   0x7   :  { %18 = vsyncpa [#allocation4 + $0x1], 0 }
   0x8   :  { %19 = vsyncpa [#allocation10], 0 }
   0x9   :  { %21 = vsyncpa [#allocation10 + $0x1], 0  ;;  %s2944_s15 = smov 0   ;;  %s2946_s16 = smov 0  }
   0xa   :  { %s2948_s17 = smov 0   ;;  %s2950_s18 = smov 0  }
   0xb   :  { %s2952_s19 = smov 0   ;;  %s2954_s20 = smov 0  }
   0xc LB: > { %3390 = sst [smem:[#allocation15_spill]] %s2902_s19  ;;  %s2975_s21 = sadd.s32 4294967295, %s2906_s20   ;;  %s2906_s20 = sphi %s2954_s20, %s27_s20   ;;  %s2902_s19 = sphi %s2952_s19, %s3415_s19   ;;  %s2898_s18 = sphi %s2950_s18, %s3414_s18   ;;  %s2894_s17 = sphi %s2948_s17, %s3418_s17   ;;  %s2890_s16 = sphi %s2946_s16, %s3417_s16   ;;  %s2886_s15 = sphi %s2944_s15, %s3416_s15  }
   0xd   : > { %3391 = sst [smem:[#allocation16_spill]] %s2906_s20  ;;  %s2368_s22 = sadd.s32 4294967294, %s2906_s20  }
   0xe   : > { %s39_s23 = sadd.s32 1, %s2902_s19  ;;  %s48_s24 = sadd.s32 1, %s2894_s17 }
   0xf   : > { %p41_p0 = scmp.ge.s32.totalorder %s39_s23, 2  ;;  %p55_p1 = scmp.ne.s32.totalorder %s2894_s17, %s2890_s16 }
  0x10   : > { %p56_p2 = scmp.eq.s32.totalorder %s2906_s20, 0  ;;  %p61_p3 = scmp.ne.s32.totalorder %s2890_s16, %s2886_s15 }
  0x11   : > { %s3420_s23 = smov (%p41_p0, %s39_s23), 0  ;;  %p62_p5 = scmp.eq.s32.totalorder %s2975_s21, 0 }
  0x12   : > { %3392 = sst [smem:[#allocation17_spill]] %s3420_s23  ;;  %p2987_p4 = por %p56_p2, %p55_p1 }
  0x13   : > { %s43_s26 = ssub.s32 %s2902_s19, %s3420_s23  ;;  %p139_p6 = scmp.eq.s32.totalorder %s2975_s21, 1 }
  0x14   : > { %p46_p7 = scmp.eq.s32.totalorder %s43_s26, 0  ;;  %p2995_p8 = por %p62_p5, %p61_p3 }
  0x15   : > { %p2999_p9 = por %p139_p6, %p55_p1  ;;  %p145_p10 = scmp.eq.s32.totalorder %s2368_s22, 1 }
  0x16   : > { %s3394_s27 = scalar_select %p2995_p8, 1, 0 }
  0x17   : > { %s3395_s28 = scalar_select %p2999_p9, 1, 0 }
  0x18   : > { %s3004_s29 = scalar_select %p46_p7, %s2894_s17, %s48_s24  }
  0x19   : > { %p3006_p11 = por %p145_p10, %p61_p3  ;;  %p2634_p13 = scmp.lt.s32.totalorder %s2906_s20, 2 }
  0x1a   : > { %3396 = sst [smem:[#allocation18_spill]] %s3004_s29  ;;  %s3378_s5 = sand.u32 1, %s2894_s17  }
  0x1b   : > { %s3397_s30 = scalar_select %p3006_p11, 1, 0 }
  0x1c   : > { %s3015_s6 = sshll.u32 %s3378_s5, 4  ;;  %s3018_s7 = sshll.u32 %s2902_s19, 8 }
  0x1d   : > { %p3022_p0 = pnand %p2634_p13, %p2987_p4  ;;  %s215_s9 = sand.u32 1, %s2906_s20  }
  0x1e   : > { %s3399_s1 = sld [smem:[#allocation19_spill]]  ;;  %s219_s13 = scalar_lea.vmem [#allocation5], %s3015_s6 }
  0x1f   : > { %s226_s14 = sshll.u32 %s219_s13, 4  ;;  %s3038_s22 = scalar_lea.sflag [#allocation6], %s215_s9  ;;  %s3035_s14 = int_to_ptr.vmem [resolvable:$true] %s226_s14 }
  0x20   : > { %p3044_p4 = pneg %p3022_p0 }
  0x24   : > { %s3031_s12 = scalar_lea.hbm %s3399_s1, %s3018_s7  ;;  %s2703_s11 = scalar_lea.hbm %s3399_s1, 512 }
  0x25   : > { %s2698_s24 = scalar_lea.hbm %s3031_s12, 256  ;;  %p2704_p7 = scmp.lt.u32.totalorder %s3031_s12, %s3399_s1 }
  0x26   : > { %p2699_p3 = scmp.ne.s32.totalorder %s3031_s12, %s2698_s24  ;;  %p2705_p10 = scmp.lt.u32.totalorder %s2703_s11, %s2698_s24 }
  0x27   : > { %p2707_p12 = scmp.lt.u32.totalorder %s2698_s24, %s3031_s12 }
  0x28   : > { %p2701_p5 = pnand %p3044_p4, %p2699_p3  ;;  %p2706_p13 = por %p2705_p10, %p2704_p7 }
  0x2a   : > { %p2702_p6 = pneg %p2701_p5  ;;  %p2708_p1 = por %p2707_p12, %p2706_p13 }
  0x2c   : > { %p2709_p2 = pnand %p2708_p1, %p2702_p6 }
  0x2e   : > { %2712 = shalt.err (!%p2709_p2)
}
  0x2f   : > { %s2713_s9 = scalar_lea.vmem %s3035_s14, 256  ;;  %s2908_s26 = smov [#allocation5]  }
  0x30   : > { %p2714_p3 = scmp.ne.s32.totalorder %s3035_s14, %s2713_s9  ;;  %s2718_s10 = sshll.u32 %s2908_s26, 4  ;;  %s2719_s10 = int_to_ptr.vmem [resolvable:$false] %s2718_s10 }
  0x31   : > { %s2720_s5 = scalar_lea.vmem %s2719_s10, 512  ;;  %p2721_p9 = scmp.lt.s32.totalorder %s3035_s14, %s2719_s10 }
  0x32   : > { %p2716_p5 = pnand %p2714_p3, %p3044_p4  ;;  %p2722_p8 = scmp.lt.s32.totalorder %s2720_s5, %s2713_s9 }
  0x34   : > { %p2717_p11 = pneg %p2716_p5  ;;  %p2723_p7 = por %p2722_p8, %p2721_p9 }
  0x36   : > { %p2724_p10 = pnand %p2723_p7, %p2717_p11 }
  0x38   : > { %2727 = shalt.err (!%p2724_p10)
}
  0x39   : > { %s3381_s24 = smov 128   ;;  %s3383_s11 = smov 8  }
  0x3a   : > { %2623 = dma.hbm_to_vmem [thread:$0]  (!%p3022_p0), %s3031_s12, 256, %s3035_s14, %s3038_s22, %s3381_s24, %s3381_s24, %s3383_s11  }
  0x3b   : > { %p3401_p8 = scmp.lt.s32.totalorder %s2906_s20, 3  ;;  %p3402_p9 = scmp.ge.s32.totalorder %s2906_s20, 1 }
  0x3c   : > { %s3083_s10 = scalar_lea.hbm %s3373_s0, %s3018_s7  ;;  %s197_s5 = scalar_lea.vmem [#allocation2], %s3015_s6 }
  0x3d   : > { %p3075_p11 = pnand %p3402_p9, %p3401_p8  ;;  %s205_s1 = sshll.u32 %s197_s5, 4  ;;  %s3086_s1 = int_to_ptr.vmem [resolvable:$true] %s205_s1 }
  0x3e   : > { %s3092_s24 = scalar_lea.hbm %s3375_s2, %s3018_s7  ;;  %s3404_s11 = sand.u32 1, %s2894_s17  }
  0x3f   : > { %s3403_s13 = scalar_select %p3075_p11, 1, 0 }
  0x40   : > { %s3096_s23 = scalar_lea.sflag [#allocation3], %s3404_s11  ;;  %s2728_s19 = scalar_lea.hbm %s3083_s10, 256 }
  0x41   : > { %p2729_p12 = scmp.ne.s32.totalorder %s3083_s10, %s2728_s19  ;;  %s2733_s29 = scalar_lea.hbm %s3373_s0, 512 }
  0x42   : > { %p2734_p6 = scmp.lt.u32.totalorder %s3083_s10, %s3373_s0  ;;  %p2735_p13 = scmp.lt.u32.totalorder %s2733_s29, %s2728_s19 }
  0x43   : > { %p2731_p1 = pnand %p2729_p12, %p3044_p4  ;;  %p2737_p5 = scmp.lt.u32.totalorder %s2728_s19, %s3083_s10 }
  0x44   : > { %p2736_p3 = por %p2735_p13, %p2734_p6 }
  0x45   : > { %p2732_p2 = pneg %p2731_p1 }
  0x46   : > { %p2738_p7 = por %p2737_p5, %p2736_p3 }
  0x48   : > { %p2739_p10 = pnand %p2738_p7, %p2732_p2 }
  0x4a   : > { %2742 = shalt.err (!%p2739_p10)
}
  0x4b   : > { %s2743_s7 = scalar_lea.vmem %s3086_s1, 256  ;;  %s2911_s11 = smov [#allocation2]  }
  0x4c   : > { %p2744_p8 = scmp.ne.s32.totalorder %s3086_s1, %s2743_s7  ;;  %s2748_s12 = sshll.u32 %s2911_s11, 4  ;;  %s2749_s12 = int_to_ptr.vmem [resolvable:$false] %s2748_s12 }
  0x4d   : > { %s2750_s20 = scalar_lea.vmem %s2749_s12, 512  ;;  %p2751_p1 = scmp.lt.s32.totalorder %s3086_s1, %s2749_s12 }
  0x4e   : > { %p2746_p9 = pnand %p2744_p8, %p3044_p4  ;;  %p2752_p11 = scmp.lt.s32.totalorder %s2750_s20, %s2743_s7 }
  0x50   : > { %p2747_p12 = pneg %p2746_p9  ;;  %p2753_p6 = por %p2752_p11, %p2751_p1 }
  0x52   : > { %p2754_p13 = pnand %p2753_p6, %p2747_p12 }
  0x54   : > { %2757 = shalt.err (!%p2754_p13)
}
  0x55   : > { %s3405_s19 = smov 8   ;;  %s3406_s29 = smov 128  }
  0x56   : > { %2620 = dma.hbm_to_vmem [thread:$0]  (!%p3022_p0), %s3083_s10, 256, %s3086_s1, %s3096_s23, %s3406_s29, %s3406_s29, %s3405_s19  }
  0x57   : > { %s240_s14 = scalar_lea.vmem [#allocation7], %s3015_s6  ;;  %s2758_s26 = scalar_lea.hbm %s3092_s24, 256 }
  0x58   : > { %s247_s9 = sshll.u32 %s240_s14, 4  ;;  %p2759_p11 = scmp.ne.s32.totalorder %s3092_s24, %s2758_s26  ;;  %s3124_s9 = int_to_ptr.vmem [resolvable:$true] %s247_s9 }
  0x59   : > { %s2763_s11 = scalar_lea.hbm %s3375_s2, 512  ;;  %p2764_p5 = scmp.lt.u32.totalorder %s3092_s24, %s3375_s2 }
  0x5a   : > { %p2761_p2 = pnand %p2759_p11, %p3044_p4  ;;  %p2765_p7 = scmp.lt.u32.totalorder %s2763_s11, %s2758_s26 }
  0x5b   : > { %p2767_p8 = scmp.lt.u32.totalorder %s2758_s26, %s3092_s24 }
  0x5c   : > { %p2762_p3 = pneg %p2761_p2  ;;  %p2766_p10 = por %p2765_p7, %p2764_p5 }
  0x5e   : > { %p2768_p9 = por %p2767_p8, %p2766_p10 }
  0x60   : > { %p2769_p12 = pnand %p2768_p9, %p2762_p3 }
  0x62   : > { %2772 = shalt.err (!%p2769_p12)
}
  0x63   : > { %s2773_s1 = scalar_lea.vmem %s3124_s9, 256  ;;  %s2912_s23 = smov [#allocation7]  }
  0x64   : > { %p2774_p1 = scmp.ne.s32.totalorder %s3124_s9, %s2773_s1  ;;  %s2778_s6 = sshll.u32 %s2912_s23, 4  ;;  %s2779_s6 = int_to_ptr.vmem [resolvable:$false] %s2778_s6 }
  0x65   : > { %s2780_s10 = scalar_lea.vmem %s2779_s6, 512  ;;  %p2781_p11 = scmp.lt.s32.totalorder %s3124_s9, %s2779_s6 }
  0x66   : > { %p2776_p6 = pnand %p2774_p1, %p3044_p4  ;;  %p2782_p2 = scmp.lt.s32.totalorder %s2780_s10, %s2773_s1 }
  0x68   : > { %p2777_p13 = pneg %p2776_p6  ;;  %p2783_p5 = por %p2782_p2, %p2781_p11 }
  0x6a   : > { %p2784_p7 = pnand %p2783_p5, %p2777_p13 }
  0x6c   : > { %2787 = shalt.err (!%p2784_p7)
}
  0x6d   : > { %2626 = dma.hbm_to_vmem [thread:$0]  (!%p3022_p0), %s3092_s24, 256, %s3124_s9, %s3038_s22, %s3406_s29, %s3406_s29, %s3405_s19  }
  0x6e   : > { %p3407_p4 = scmp.ne.s32.totalorder %s3403_s13, 0 }
  0x6f   : > { %s3154_s25 = sand.u32 (!%p3407_p4), 1, %s2890_s16   ;;  %p3408_p3 = scmp.ne.s32.totalorder (!%p3407_p4), %s3394_s27, 0 }
  0x70   : > { %259 = sbr.rel (%p3407_p4) target bundleno = 985 (0x3d9), region = 32  ;;  %s3157_s14 = sshll.u32 (!%p3407_p4), %s3154_s25, 4 }
  0x71   : > { %s262_s8 = scalar_lea.sflag (!%p3407_p4), [#allocation3], %s3154_s25  ;;  %s265_s26 = scalar_lea.vmem (!%p3407_p4), [#allocation2], %s3157_s14 }
  0x77   : > { %2869 = dma.done.wait (%p3408_p3), %s262_s8, 256  }
  0x78   : > { %2871 = vsyncadd (%p3408_p3), %s262_s8, 4294967040  ;;  %s270_s22 = sand.u32 1, %s2975_s21   ;;  %s274_s13 = scalar_lea.vmem [#allocation5], %s3157_s14 }
  0x79   : > { %s271_s24 = scalar_lea.sflag [#allocation6], %s270_s22 }
  0x7a   : > { %2873 = dma.done.wait (%p3408_p3), %s271_s24, 512  }
  0x7b   : > { %2875 = vsyncadd (%p3408_p3), %s271_s24, 4294966784  ;;  %v2913_v0 = vmov 0.0   ;;  %vm2914_vm0 = vmmov 0   ;;  %v332_v1 = vld [vmem:[%s274_s13] sm:$0xff]  ;;  %vm336_vm1 = vcmask 261120   ;;  %v333_v2 = vld [vmem:[%s274_s13 + $0x8] sm:$0xff] }
  0x7c   : > { %2447 = vmatprep.subr.mxu0 %v2913_v0  ;;  %2477 = vmatprep.subr.mxu1 %v2913_v0  ;;  %v328_v3 = vld [vmem:[%s265_s26] sm:$0xff]  ;;  %v341_v4 = vsel %vm336_vm1, %v332_v1, 0  ;;  %v793_v5 = vsel %vm336_vm1, %v333_v2, 0  ;;  %v329_v7 = vld [vmem:[%s265_s26 + $0x8] sm:$0xff]  ;;  %vm1241_vm2 = vcmask 64512   ;;  %s283_s21 = scalar_lea.vmem [#allocation7], %s3157_s14 }
  0x7d   : > { %2449 = vmatprep.mubr.msk.f32.mxu0 %vm2914_vm0, %v2913_v0  ;;  %2479 = vmatprep.mubr.msk.f32.mxu1 %vm2914_vm0, %v2913_v0  ;;  %v330_v6 = vmul.f32 0.17677669, %v328_v3  ;;  %v344_v8 = vand.u32 4294901760, %v341_v4  ;;  %v796_v9 = vand.u32 4294901760, %v793_v5  ;;  %v331_v10 = vmul.f32 0.17677669, %v329_v7 }
  0x7e   : > { %v334_v47 = vld [vmem:[%s283_s21] sm:$0xff]  ;;  %v335_v49 = vld [vmem:[%s283_s21 + $0x8] sm:$0xff]  ;;  %s3234_s27 = scalar_lea.vmem [#allocation9], %s3157_s14  ;;  %s2397_s19 = sshll.u32 %s2898_s18, 8 }
  0x7f   : > { %v338_v11 = vsel %vm336_vm1, %v330_v6, 0  ;;  %2448 = vmatpush3.xpose.msra.mxu0 %v344_v8  ;;  %v421_v12 = vsub.f32 %v341_v4, %v344_v8  ;;  %2478 = vmatpush3.xpose.msra.mxu1 %v796_v9  ;;  %v873_v13 = vsub.f32 %v793_v5, %v796_v9  ;;  %v790_v15 = vsel %vm336_vm1, %v331_v10, 0  ;;  %s3279_s5 = scalar_lea.hbm %s3377_s4, %s2397_s19  ;;  %s2205_s7 = sshll.u32 %s3234_s27, 4  ;;  %s3282_s7 = int_to_ptr.vmem [resolvable:$true] %s2205_s7 }
  0x80   : > { %v409_v14 = vand.u32 4294901760, %v338_v11  ;;  %2452 = vmatprep.subr.mxu0 %v2913_v0  ;;  %v861_v16 = vand.u32 4294901760, %v790_v15  ;;  %2482 = vmatprep.subr.mxu1 %v2913_v0  ;;  %v3222_v48 = vand.u32 4294901760, %v334_v47  ;;  %v3226_v50 = vand.u32 4294901760, %v335_v49  ;;  %s2174_s11 = scalar_lea.sflag [#allocation10], %s3154_s25  ;;  %s2788_s12 = scalar_lea.vmem %s3282_s7, 256 }
  0x81   : > { %v422_v18 = vand.u32 4294901760, %v421_v12  ;;  %v874_v19 = vand.u32 4294901760, %v873_v13  ;;  %p2789_p0 = scmp.ne.s32.totalorder %s3282_s7, %s2788_s12  ;;  %p3409_p10 = scmp.ne.s32.totalorder %s3395_s28, 0 }
  0x82   : > { %v410_v17 = vsub.f32 %v338_v11, %v409_v14  ;;  %v862_v20 = vsub.f32 %v790_v15, %v861_v16  ;;  %v1347_v53 = vsub.f32 %v334_v47, %v3222_v48  ;;  %v1796_v57 = vsub.f32 %v335_v49, %v3226_v50  ;;  %s2915_s20 = smov [#allocation9]  }
  0x83   : > { %v423_v22 = vsub.f32 %v421_v12, %v422_v18  ;;  %v875_v23 = vsub.f32 %v873_v13, %v874_v19  ;;  %p2790_p8 = pnand %p2789_p0, %p3409_p10  ;;  %s2792_s1 = sshll.u32 %s2915_s20, 4  ;;  %s2793_s1 = int_to_ptr.vmem [resolvable:$false] %s2792_s1 }
  0x84   : > { %v411_v21 = vand.u32 4294901760, %v410_v17  ;;  %v863_v24 = vand.u32 4294901760, %v862_v20  ;;  %v1348_v58 = vand.u32 4294901760, %v1347_v53  ;;  %v1797_v2 = vand.u32 4294901760, %v1796_v57  ;;  %s2794_s23 = scalar_lea.vmem %s2793_s1, 512  ;;  %p2795_p12 = scmp.lt.s32.totalorder %s3282_s7, %s2793_s1 }
  0x85   : > { %v424_v26 = vand.u32 4294901760, %v423_v22  ;;  %v876_v29 = vand.u32 4294901760, %v875_v23  ;;  %p2791_p9 = pneg %p2790_p8  ;;  %p2796_p1 = scmp.lt.s32.totalorder %s2794_s23, %s2788_s12 }
  0x86   : > { %v412_v25 = vsub.f32 %v410_v17, %v411_v21  ;;  %v864_v27 = vsub.f32 %v862_v20, %v863_v24  ;;  %v1349_v1 = vsub.f32 %v1347_v53, %v1348_v58 }
  0x87   : > { %p2797_p6 = por %p2796_p1, %p2795_p12 }
  0x88   : > { %v413_v28 = vand.u32 4294901760, %v412_v25  ;;  %v865_v30 = vand.u32 4294901760, %v864_v27  ;;  %v1350_v7 = vand.u32 4294901760, %v1349_v1 }
  0x89   : > { %p2798_p13 = pnand %p2797_p6, %p2791_p9 }
  0x8a   : > { %2450 = vmatmul.mubr.f32.vlgmr.msra.gmra.mrb[0].mxu0 %v413_v28  ;;  %2480 = vmatmul.mubr.f32.vlgmr.msra.gmra.mrb[0].mxu1 %v865_v30 }
  0x8b   : > { %2453 = vmatpush3.xpose.msra.mxu0 %v424_v26  ;;  %2483 = vmatpush3.xpose.msra.mxu1 %v876_v29 }
  0x8c   : > { %2454 = vmatprep.mubr.msk.f32.mxu0 %vm2914_vm0, %v2913_v0  ;;  %2457 = vmatprep.subr.mxu0 %v2913_v0 }
  0x8d   : > { %2484 = vmatprep.mubr.msk.f32.mxu1 %vm2914_vm0, %v2913_v0  ;;  %2487 = vmatprep.subr.mxu1 %v2913_v0 }
  0x92   : > { %2455 = vmatmul.mubr.f32.vlgmr.msra.gmra.mrb[0].mxu0 %v409_v14  ;;  %2485 = vmatmul.mubr.f32.vlgmr.msra.gmra.mrb[0].mxu1 %v861_v16 }
  0x93   : > { %2458 = vmatpush3.xpose.msra.mxu0 %v421_v12  ;;  %2488 = vmatpush3.xpose.msra.mxu1 %v873_v13 }
  0x94   : > { %2459 = vmatprep.mubr.msk.f32.mxu0 %vm2914_vm0, %v2913_v0  ;;  %2462 = vmatprep.subr.mxu0 %v2913_v0 }
  0x95   : > { %2489 = vmatprep.mubr.msk.f32.mxu1 %vm2914_vm0, %v2913_v0  ;;  %2492 = vmatprep.subr.mxu1 %v2913_v0 }
  0x9a   : > { %2460 = vmatmul.mubr.f32.vlgmr.msra.gmra.mrb[0].mxu0 %v410_v17  ;;  %2490 = vmatmul.mubr.f32.vlgmr.msra.gmra.mrb[0].mxu1 %v862_v20 }
  0x9b   : > { %2463 = vmatpush3.xpose.msra.mxu0 %v344_v8  ;;  %2493 = vmatpush3.xpose.msra.mxu1 %v796_v9 }
  0x9c   : > { %2464 = vmatprep.mubr.msk.f32.mxu0 %vm2914_vm0, %v2913_v0  ;;  %2467 = vmatprep.subr.mxu0 %v2913_v0 }
  0x9d   : > { %2494 = vmatprep.mubr.msk.f32.mxu1 %vm2914_vm0, %v2913_v0  ;;  %2497 = vmatprep.subr.mxu1 %v2913_v0 }
  0xa2   : > { %2465 = vmatmul.mubr.f32.vlgmr.msra.gmra.mrb[0].mxu0 %v411_v21  ;;  %2495 = vmatmul.mubr.f32.vlgmr.msra.gmra.mrb[0].mxu1 %v863_v24 }
  0xa3   : > { %2468 = vmatpush3.xpose.msra.mxu0 %v422_v18  ;;  %2498 = vmatpush3.xpose.msra.mxu1 %v874_v19 }
  0xa4   : > { %2469 = vmatprep.mubr.msk.f32.mxu0 %vm2914_vm0, %v2913_v0  ;;  %2472 = vmatprep.subr.mxu0 %v2913_v0 }
  0xa5   : > { %2499 = vmatprep.mubr.msk.f32.mxu1 %vm2914_vm0, %v2913_v0  ;;  %2502 = vmatprep.subr.mxu1 %v2913_v0 }
  0xaa   : > { %2470 = vmatmul.mubr.f32.vlgmr.msra.gmra.mrb[0].mxu0 %v409_v14  ;;  %2500 = vmatmul.mubr.f32.vlgmr.msra.gmra.mrb[0].mxu1 %v861_v16 }
  0xab   : > { %2473 = vmatpush3.xpose.msra.mxu0 %v344_v8  ;;  %2503 = vmatpush3.xpose.msra.mxu1 %v796_v9  ;;  %v1798_v8 = vsub.f32 %v1796_v57, %v1797_v2 }
  0xac   : > { %2474 = vmatprep.mubr.msk.f32.mxu0 %vm2914_vm0, %v2913_v0  ;;  %2504 = vmatprep.mubr.msk.f32.mxu1 %vm2914_vm0, %v2913_v0 }
  0xad   : > { %2507 = vmatprep.subr.mxu0 %v2913_v0  ;;  %2537 = vmatprep.subr.mxu1 %v2913_v0  ;;  %v1799_v12 = vand.u32 4294901760, %v1798_v8 }
  0xb2   : > { %2475 = vmatmul.mubr.f32.vlgmr.msra.gmra.mrb[0].mxu0 %v409_v14  ;;  %2505 = vmatmul.mubr.f32.vlgmr.msra.gmra.mrb[0].mxu1 %v861_v16 }
  0xb3   : > { %2509 = vmatprep.mubr.msk.f32.mxu0 %vm2914_vm0, %v2913_v0  ;;  %2539 = vmatprep.mubr.msk.f32.mxu1 %vm2914_vm0, %v2913_v0 }
  0xb4   : > { %2508 = vmatpush3.msra.mxu0 %v3222_v48  ;;  %2538 = vmatpush3.msra.mxu1 %v3226_v50 }
  0xb5   : > { %2512 = vmatprep.subr.mxu0 %v2913_v0  ;;  %2542 = vmatprep.subr.mxu1 %v2913_v0 }
 0x185   : > { %v785_v31 = vpop.f32.mrb[0].mxu0  ;;  %v1237_v32 = vpop.f32.mrb[0].mxu1 }
 0x186   : > { %v2476_v33 = vpop.f32.mrb[1].mxu0  ;;  %v1242_v34 = vsel %vm1241_vm2, %v785_v31, -inf  ;;  %v2506_v35 = vpop.f32.mrb[1].mxu1  ;;  %v1245_v36 = vsel %vm1241_vm2, %v1237_v32, -inf }
 0x187   : > { %1243 = vmax.xlane.f32.xlu0 %v1242_v34 }
 0x18b   : > { %1246 = vmax.xlane.f32.xlu0 %v1245_v36 }
 0x214   : > { %v1244_v37 = vpop.xlane.xlu0 %1243 }
 0x215   : > { %v1248_v38 = vsub.f32 %v785_v31, %v1244_v37 }
 0x217   : > { %v1250_v39 = vmul.f32 1.442695, %v1248_v38 }
 0x218   : > { %v1247_v40 = vpop.xlane.xlu0 %1246 }
 0x219   : > { %2690 = vpow2.f32 %v1250_v39  ;;  %v1249_v41 = vsub.f32 %v1237_v32, %v1247_v40 }
 0x21b   : > { %v1252_v42 = vmul.f32 1.442695, %v1249_v41 }
 0x21d   : > { %2692 = vpow2.f32 %v1252_v42 }
 0x223   : > { %v2691_v43 = vpop.eup %2690 }
 0x224   : > { %v1254_v44 = vsel %vm1241_vm2, %v2691_v43, 0.0 }
 0x225   : > { %1255 = vadd.xlane.f32.xlu1 %v1254_v44 }
 0x227   : > { %v2693_v45 = vpop.eup %2692 }
 0x228   : > { %v1257_v46 = vsel %vm1241_vm2, %v2693_v45, 0.0 }
 0x229   : > { %1258 = vadd.xlane.f32.xlu1 %v1257_v46 }
 0x2b2   : > { %v1256_v51 = vpop.xlane.xlu1 %1255 }
 0x2b3   : > { %2694 = vrcp.f32 %v1256_v51 }
 0x2b6   : > { %v1259_v52 = vpop.xlane.xlu1 %1258 }
 0x2b7   : > { %2696 = vrcp.f32 %v1259_v52 }
 0x2bd   : > { %v2695_v54 = vpop.eup %2694 }
 0x2be   : > { %v1264_v55 = vmul.f32 %v2695_v54, %v2691_v43 }
 0x2c0   : > { %v1267_v56 = vsel %vm1241_vm2, %v1264_v55, 0  ;;  %2166 = vst.msk [vmem:[%s3234_s27] sm:$0xff] %vm1241_vm2, %v1264_v55 }
 0x2c1   : > { %v2697_v59 = vpop.eup %2696  ;;  %v1335_v60 = vand.u32 4294901760, %v1267_v56 }
 0x2c2   : > { %v1265_v61 = vmul.f32 %v2697_v59, %v2693_v45 }
 0x2c3   : > { %v1336_v62 = vsub.f32 %v1267_v56, %v1335_v60 }
 0x2c4   : > { %v1716_v63 = vsel %vm1241_vm2, %v1265_v61, 0  ;;  %2167 = vst.msk [vmem:[%s3234_s27 + $0x8] sm:$0xff] %vm1241_vm2, %v1265_v61 }
 0x2c5   : > { %v1784_v3 = vand.u32 4294901760, %v1716_v63  ;;  %v1337_v4 = vand.u32 4294901760, %v1336_v62 }
 0x2c7   : > { %v1338_v5 = vsub.f32 %v1336_v62, %v1337_v4  ;;  %v1785_v6 = vsub.f32 %v1716_v63, %v1784_v3 }
 0x2c9   : > { %v1339_v9 = vand.u32 4294901760, %v1338_v5  ;;  %v1786_v10 = vand.u32 4294901760, %v1785_v6 }
 0x2cb   : > { %2510 = vmatmul.mubr.f32.vlgmr.msra.gmra.mrb[2].mxu0 %v1339_v9  ;;  %v1787_v11 = vsub.f32 %v1785_v6, %v1786_v10 }
 0x2cc   : > { %2513 = vmatpush3.msra.mxu0 %v1350_v7  ;;  %2514 = vmatprep.mubr.msk.f32.mxu0 %vm2914_vm0, %v2913_v0 }
 0x2cd   : > { %v1788_v13 = vand.u32 4294901760, %v1787_v11  ;;  %2517 = vmatprep.subr.mxu0 %v2913_v0 }
 0x2cf   : > { %2540 = vmatmul.mubr.f32.vlgmr.msra.gmra.mrb[2].mxu1 %v1788_v13 }
 0x2d0   : > { %2543 = vmatpush3.msra.mxu1 %v1799_v12  ;;  %2544 = vmatprep.mubr.msk.f32.mxu1 %vm2914_vm0, %v2913_v0 }
 0x2d1   : > { %2547 = vmatprep.subr.mxu1 %v2913_v0 }
 0x2d3   : > { %2515 = vmatmul.mubr.f32.vlgmr.msra.gmra.mrb[2].mxu0 %v1335_v60 }
 0x2d4   : > { %2518 = vmatpush3.msra.mxu0 %v1347_v53  ;;  %2519 = vmatprep.mubr.msk.f32.mxu0 %vm2914_vm0, %v2913_v0 }
 0x2d5   : > { %2522 = vmatprep.subr.mxu0 %v2913_v0 }
 0x2d7   : > { %2545 = vmatmul.mubr.f32.vlgmr.msra.gmra.mrb[2].mxu1 %v1784_v3 }
 0x2d8   : > { %2548 = vmatpush3.msra.mxu1 %v1796_v57  ;;  %2549 = vmatprep.mubr.msk.f32.mxu1 %vm2914_vm0, %v2913_v0 }
 0x2d9   : > { %2552 = vmatprep.subr.mxu1 %v2913_v0 }
 0x2db   : > { %2520 = vmatmul.mubr.f32.vlgmr.msra.gmra.mrb[2].mxu0 %v1336_v62 }
 0x2dc   : > { %2523 = vmatpush3.msra.mxu0 %v3222_v48  ;;  %2524 = vmatprep.mubr.msk.f32.mxu0 %vm2914_vm0, %v2913_v0 }
 0x2dd   : > { %2527 = vmatprep.subr.mxu0 %v2913_v0 }
 0x2df   : > { %2550 = vmatmul.mubr.f32.vlgmr.msra.gmra.mrb[2].mxu1 %v1785_v6 }
 0x2e0   : > { %2553 = vmatpush3.msra.mxu1 %v3226_v50  ;;  %2554 = vmatprep.mubr.msk.f32.mxu1 %vm2914_vm0, %v2913_v0 }
 0x2e1   : > { %2557 = vmatprep.subr.mxu1 %v2913_v0 }
 0x2e3   : > { %2525 = vmatmul.mubr.f32.vlgmr.msra.gmra.mrb[2].mxu0 %v1337_v4 }
 0x2e4   : > { %2528 = vmatpush3.msra.mxu0 %v1348_v58  ;;  %2529 = vmatprep.mubr.msk.f32.mxu0 %vm2914_vm0, %v2913_v0 }
 0x2e5   : > { %2532 = vmatprep.subr.mxu0 %v2913_v0 }
 0x2e7   : > { %2555 = vmatmul.mubr.f32.vlgmr.msra.gmra.mrb[2].mxu1 %v1786_v10 }
 0x2e8   : > { %2558 = vmatpush3.msra.mxu1 %v1797_v2  ;;  %2559 = vmatprep.mubr.msk.f32.mxu1 %vm2914_vm0, %v2913_v0 }
 0x2e9   : > { %2562 = vmatprep.subr.mxu1 %v2913_v0 }
 0x2eb   : > { %2530 = vmatmul.mubr.f32.vlgmr.msra.gmra.mrb[2].mxu0 %v1335_v60 }
 0x2ec   : > { %2533 = vmatpush3.msra.mxu0 %v3222_v48  ;;  %2534 = vmatprep.mubr.msk.f32.mxu0 %vm2914_vm0, %v2913_v0 }
 0x2ef   : > { %2560 = vmatmul.mubr.f32.vlgmr.msra.gmra.mrb[2].mxu1 %v1784_v3 }
 0x2f0   : > { %2563 = vmatpush3.msra.mxu1 %v3226_v50  ;;  %2564 = vmatprep.mubr.msk.f32.mxu1 %vm2914_vm0, %v2913_v0 }
 0x2f3   : > { %2535 = vmatmul.mubr.f32.vlgmr.msra.gmra.mrb[2].mxu0 %v1335_v60 }
 0x2f7   : > { %2565 = vmatmul.mubr.f32.vlgmr.msra.gmra.mrb[2].mxu1 %v1784_v3 }
 0x2f8   : > { %2801 = shalt.err (!%p2798_p13)
}
 0x2f9   : > { %s2802_s6 = scalar_lea.hbm %s3279_s5, 256  ;;  %s2806_s26 = scalar_lea.hbm %s3377_s4, 512 }
 0x2fa   : > { %p2803_p11 = scmp.ne.s32.totalorder %s3279_s5, %s2802_s6  ;;  %p2807_p7 = scmp.lt.u32.totalorder %s3279_s5, %s3377_s4 }
 0x2fb   : > { %p2808_p4 = scmp.lt.u32.totalorder %s2806_s26, %s2802_s6  ;;  %p2810_p0 = scmp.lt.u32.totalorder %s2802_s6, %s3279_s5 }
 0x2fc   : > { %p2804_p2 = pnand %p2803_p11, %p3409_p10 }
 0x2fd   : > { %p2809_p3 = por %p2808_p4, %p2807_p7 }
 0x2fe   : > { %p2805_p5 = pneg %p2804_p2 }
 0x2ff   : > { %p2811_p8 = por %p2810_p0, %p2809_p3 }
 0x301   : > { %p2812_p9 = pnand %p2811_p8, %p2805_p5 }
 0x303   : > { %2815 = shalt.err (!%p2812_p9)
}
 0x304   : > { %s2916_s13 = smov 128   ;;  %s2917_s21 = smov 8  }
 0x305   : > { %2614 = dma.vmem_to_hbm [thread:$0]  (%p3409_p10), %s3282_s7, 256, %s3279_s5, %s2174_s11, %s2916_s13, %s2916_s13, %s2917_s21  }
 0x306   : > { %s315_s27 = scalar_lea.vmem [#allocation8], %s3157_s14  ;;  %s3320_s20 = scalar_lea.hbm %s3376_s3, %s2397_s19 }
 0x307   : > { %s2188_s29 = sshll.u32 %s315_s27, 4  ;;  %s2169_s14 = scalar_lea.sflag [#allocation4], %s3154_s25  ;;  %s3313_s29 = int_to_ptr.vmem [resolvable:$true] %s2188_s29 }
 0x308   : > { %s2816_s5 = scalar_lea.vmem %s3313_s29, 256  ;;  %s2918_s7 = smov [#allocation8]  }
 0x309   : > { %p2817_p12 = scmp.ne.s32.totalorder %s3313_s29, %s2816_s5  ;;  %s2820_s18 = sshll.u32 %s2918_s7, 4  ;;  %s2821_s18 = int_to_ptr.vmem [resolvable:$false] %s2820_s18 }
 0x30a   : > { %s2822_s11 = scalar_lea.vmem %s2821_s18, 512  ;;  %p2823_p13 = scmp.lt.s32.totalorder %s3313_s29, %s2821_s18 }
 0x30b   : > { %p2818_p1 = pnand %p2817_p12, %p3409_p10  ;;  %p2824_p11 = scmp.lt.s32.totalorder %s2822_s11, %s2816_s5 }
 0x30d   : > { %p2819_p6 = pneg %p2818_p1  ;;  %p2825_p2 = por %p2824_p11, %p2823_p13 }
 0x30f   : > { %p2826_p5 = pnand %p2825_p2, %p2819_p6 }
 0x3c6   : > { %v1711_v0 = vpop.f32.mrb[2].mxu0 }
 0x3c7   : > { %2164 = vst.msk [vmem:[%s315_s27] sm:$0xff] %vm336_vm1, %v1711_v0  ;;  %v2536_v14 = vpop.f32.mrb[3].mxu0 }
 0x3ca   : > { %v2160_v15 = vpop.f32.mrb[2].mxu1 }
 0x3cb   : > { %2165 = vst.msk [vmem:[%s315_s27 + $0x8] sm:$0xff] %vm336_vm1, %v2160_v15  ;;  %v2566_v16 = vpop.f32.mrb[3].mxu1 }
 0x3cc   : > { %2829 = shalt.err (!%p2826_p5)
}
 0x3cd   : > { %s2830_s19 = scalar_lea.hbm %s3320_s20, 256  ;;  %s2834_s6 = scalar_lea.hbm %s3376_s3, 512 }
 0x3ce   : > { %p2831_p7 = scmp.ne.s32.totalorder %s3320_s20, %s2830_s19  ;;  %p2835_p0 = scmp.lt.u32.totalorder %s3320_s20, %s3376_s3 }
 0x3cf   : > { %p2836_p8 = scmp.lt.u32.totalorder %s2834_s6, %s2830_s19  ;;  %p2838_p12 = scmp.lt.u32.totalorder %s2830_s19, %s3320_s20 }
 0x3d0   : > { %p2832_p4 = pnand %p2831_p7, %p3409_p10 }
 0x3d1   : > { %p2837_p9 = por %p2836_p8, %p2835_p0 }
 0x3d2   : > { %p2833_p3 = pneg %p2832_p4 }
 0x3d3   : > { %p2839_p1 = por %p2838_p12, %p2837_p9 }
 0x3d5   : > { %p2840_p6 = pnand %p2839_p1, %p2833_p3 }
 0x3d7   : > { %2843 = shalt.err (!%p2840_p6)
}
 0x3d8   : > { %2613 = dma.vmem_to_hbm [thread:$0]  (%p3409_p10), %s3313_s29, 256, %s3320_s20, %s2169_s14, %s2916_s13, %s2916_s13, %s2917_s21  }
 0x3d9 PF: > { %s3410_s26 = sld [smem:[#allocation16_spill]]  ;;  %s2220_s22 = sand.u32 1, %s2886_s15  }
 0x3da   : > { %p3411_p13 = scmp.ne.s32.totalorder %s3397_s30, 0  ;;  %s2221_s24 = scalar_lea.sflag [#allocation4], %s2220_s22 }
 0x3df   : > { %p3412_p11 = scmp.ge.s32.totalorder %s3410_s26, 2 }
 0x3e1   : > { %p2628_p2 = pnand %p3412_p11, %p3411_p13 }
 0x3e3   : > { %2877 = dma.done.wait (!%p2628_p2), %s2221_s24, 256  }
 0x3e4   : > { %2879 = vsyncadd (!%p2628_p2), %s2221_s24, 4294967040  ;;  %s2230_s28 = scalar_lea.sflag [#allocation10], %s2220_s22 }
 0x3e5   : > { %2881 = dma.done.wait (!%p2628_p2), %s2230_s28, 256  }
 0x3e6   : > { %2883 = vsyncadd (!%p2628_p2), %s2230_s28, 4294967040  ;;  %s27_s20 = sadd.s32 1, %s3410_s26   ;;  %s3413_s25 = sld [smem:[#allocation18_spill]] }
 0x3e7   : > { %p24_p5 = scmp.ge.s32.totalorder %s27_s20, 4   ;;  %s3414_s18 = sld [smem:[#allocation15_spill]] }
 0x3e8   : > { %s3415_s19 = sld [smem:[#allocation17_spill]]  ;;  %s3416_s15 = smov %s2890_s16 }
 0x3e9   : > { %s3417_s16 = smov %s2894_s17  ;;  %26 = sbr.rel (!%p24_p5) target bundleno = 12 (0xc), region = 118 }
 0x3ec   : > { %s3418_s17 = smov %s3413_s25 }
 0x3f0   :  { %2235 = vsyncpa [#allocation3], 1 }
 0x3f1   :  { %2237 = vsyncpa [#allocation3 + $0x1], 1 }
 0x3f2   :  { %2238 = vsyncpa [#allocation6], 1 }
 0x3f3   :  { %2240 = vsyncpa [#allocation6 + $0x1], 1 }
 0x3f4   :  { %2241 = vsyncpa [#allocation4], 1 }
 0x3f5   :  { %2243 = vsyncpa [#allocation4 + $0x1], 1 }
 0x3f6   :  { %2244 = vsyncpa [#allocation10], 1 }
 0x3f7   :  { %2246 = vsyncpa [#allocation10 + $0x1], 1 }

</bundles_post_ra>
